<compile_context>
chip_gen: v6e
topology: v6e:2x2x1
jax: 0.10.0
libtpu: 0.0.40
codegen_flags: <defaults>
</compile_context>

<pallas_src>
import jax
import jax.numpy as jnp
from jax.experimental import pallas as pl
from jax.experimental.pallas import tpu as pltpu


def _linear_kernel(xT_ref, w_ref, b_ref, o_ref):
    # xT_ref: (4, TN) VMEM tile (feature-major, lane-dense)
    # w_ref:  (4,)  SMEM scalars, b_ref: (1,) SMEM scalar
    # o_ref:  (1, TN) VMEM output tile (lane-dense)
    x0 = xT_ref[0:1, :]
    x1 = xT_ref[1:2, :]
    x2 = xT_ref[2:3, :]
    x3 = xT_ref[3:4, :]
    out = (x0 * w_ref[0]
           + x1 * w_ref[1]
           + x2 * w_ref[2]
           + x3 * w_ref[3]
           + b_ref[0])
    o_ref[...] = out.astype(o_ref.dtype)


def poly_regression_forward(x, weight, bias, *, tn=2048, min_rows_for_pallas=1024):
    """x: (N, 4) f32, weight: (1, 4) f32, bias: (1,) f32 -> (N, 1) f32."""
    n, in_f = x.shape
    out_f = weight.shape[0]

    # Tiny-N fallback: pallas_call launch overhead would be 100% of the cost.
    if n < min_rows_for_pallas:
        return x @ weight.T + bias

    # Lane-dense layout: (4, N), padded so TN (multiple of 128) tiles the lane axis.
    n_pad = pl.cdiv(n, tn) * tn
    xT = x.T
    if n_pad != n:
        xT = jnp.pad(xT, ((0, 0), (0, n_pad - n)))

    w_flat = weight.reshape(-1).astype(jnp.float32)   # (4,)  -> SMEM
    b_flat = bias.reshape(-1).astype(jnp.float32)     # (1,)  -> SMEM

    out_t = pl.pallas_call(
        _linear_kernel,
        out_shape=jax.ShapeDtypeStruct((out_f, n_pad), x.dtype),
        grid_spec=pltpu.PrefetchScalarGridSpec(
            num_scalar_prefetch=0,
            grid=(n_pad // tn,),
            in_specs=[
                pl.BlockSpec((in_f, tn), lambda i: (0, i)),
                pl.BlockSpec(memory_space=pltpu.MemorySpace.SMEM),
                pl.BlockSpec(memory_space=pltpu.MemorySpace.SMEM),
            ],
            out_specs=pl.BlockSpec((out_f, tn), lambda i: (0, i)),
        ),
        compiler_params=pltpu.CompilerParams(
            dimension_semantics=("parallel",),
        ),
    )(xT, w_flat, b_flat)

    # Back to the PyTorch-facing (N, 1) layout.
    return out_t[:, :n].T


if __name__ == "__main__":
    key = jax.random.PRNGKey(0)
    k_x, k_w, k_b, k_xs, k_xr = jax.random.split(key, 5)

    IN_F, OUT_F = 4, 1

    # Deterministic "PyTorch-like" init: U(-1/sqrt(in_f), 1/sqrt(in_f)).
    bound = 1.0 / (IN_F ** 0.5)
    weight = jax.random.uniform(k_w, (OUT_F, IN_F), jnp.float32, -bound, bound)
    bias = jax.random.uniform(k_b, (OUT_F,), jnp.float32, -bound, bound)

    # 1) Pallas path: N large enough to tile (multiple grid steps).
    N = 4096
    x = jax.random.normal(k_x, (N, IN_F), jnp.float32)
    out = jax.block_until_ready(poly_regression_forward(x, weight, bias))
    ref = x @ weight.T + bias
    assert out.shape == (N, OUT_F)
    assert jnp.allclose(out, ref, atol=1e-5, rtol=1e-5)

    # 2) Pallas path with padding (N not a multiple of the lane tile).
    Nr = 1500
    xr = jax.random.normal(k_xr, (Nr, IN_F), jnp.float32)
    outr = jax.block_until_ready(poly_regression_forward(xr, weight, bias))
    refr = xr @ weight.T + bias
    assert outr.shape == (Nr, OUT_F)
    assert jnp.allclose(outr, refr, atol=1e-5, rtol=1e-5)

    # 3) Tiny-N fallback path (matches the original PyTorch demo scale).
    xs = jax.random.normal(k_xs, (8, IN_F), jnp.float32)
    outs = jax.block_until_ready(poly_regression_forward(xs, weight, bias))
    refs = xs @ weight.T + bias
    assert outs.shape == (8, OUT_F)
    assert jnp.allclose(outs, refs, atol=1e-5, rtol=1e-5)

    print("KERNEL_OK")
</pallas_src>

<mosaic_0001>
module attributes {stable_mosaic.version = 11 : i64} {
  func.func @_linear_kernel(%arg0: i32, %arg1: memref<4x2048xf32, #tpu.memory_space<vmem>>, %arg2: memref<4xf32, #tpu.memory_space<smem>>, %arg3: memref<1xf32, #tpu.memory_space<smem>>, %arg4: memref<1x2048xf32, #tpu.memory_space<vmem>>) attributes {dimension_semantics = [#tpu.dimension_semantics<parallel>], iteration_bounds = array<i64: 2>, scalar_prefetch = 0 : i64, scratch_operands = 0 : i64, tpu.core_type = #tpu.core_type<tc>, window_params = [{transform_indices = @transform_0, window_bounds = array<i64: 4, 2048>}, {transform_indices = @transform_1, window_bounds = array<i64: 4>}, {transform_indices = @transform_2, window_bounds = array<i64: 1>}, {transform_indices = @transform_3, window_bounds = array<i64: 1, 2048>}]} {
    %c0 = arith.constant 0 : index
    %c0_0 = arith.constant 0 : index
    %0 = vector.load %arg1[%c0, %c0_0] : memref<4x2048xf32, #tpu.memory_space<vmem>>, vector<1x2048xf32>
    %c1 = arith.constant 1 : index
    %c0_1 = arith.constant 0 : index
    %1 = vector.load %arg1[%c1, %c0_1] : memref<4x2048xf32, #tpu.memory_space<vmem>>, vector<1x2048xf32>
    %c2 = arith.constant 2 : index
    %c0_2 = arith.constant 0 : index
    %2 = vector.load %arg1[%c2, %c0_2] : memref<4x2048xf32, #tpu.memory_space<vmem>>, vector<1x2048xf32>
    %c3 = arith.constant 3 : index
    %c0_3 = arith.constant 0 : index
    %3 = vector.load %arg1[%c3, %c0_3] : memref<4x2048xf32, #tpu.memory_space<vmem>>, vector<1x2048xf32>
    %c0_4 = arith.constant 0 : index
    %4 = memref.load %arg2[%c0_4] : memref<4xf32, #tpu.memory_space<smem>>
    %5 = vector.broadcast %4 : f32 to vector<1x2048xf32>
    %6 = arith.mulf %0, %5 : vector<1x2048xf32>
    %c1_5 = arith.constant 1 : index
    %7 = memref.load %arg2[%c1_5] : memref<4xf32, #tpu.memory_space<smem>>
    %8 = vector.broadcast %7 : f32 to vector<1x2048xf32>
    %9 = arith.mulf %1, %8 : vector<1x2048xf32>
    %10 = arith.addf %6, %9 : vector<1x2048xf32>
    %c2_6 = arith.constant 2 : index
    %11 = memref.load %arg2[%c2_6] : memref<4xf32, #tpu.memory_space<smem>>
    %12 = vector.broadcast %11 : f32 to vector<1x2048xf32>
    %13 = arith.mulf %2, %12 : vector<1x2048xf32>
    %14 = arith.addf %10, %13 : vector<1x2048xf32>
    %c3_7 = arith.constant 3 : index
    %15 = memref.load %arg2[%c3_7] : memref<4xf32, #tpu.memory_space<smem>>
    %16 = vector.broadcast %15 : f32 to vector<1x2048xf32>
    %17 = arith.mulf %3, %16 : vector<1x2048xf32>
    %18 = arith.addf %14, %17 : vector<1x2048xf32>
    %c0_8 = arith.constant 0 : index
    %19 = memref.load %arg3[%c0_8] : memref<1xf32, #tpu.memory_space<smem>>
    %20 = vector.broadcast %19 : f32 to vector<1x2048xf32>
    %21 = arith.addf %18, %20 : vector<1x2048xf32>
    %c0_9 = arith.constant 0 : index
    %c0_10 = arith.constant 0 : index
    %22 = vector.load %arg4[%c0_9, %c0_10] : memref<1x2048xf32, #tpu.memory_space<vmem>>, vector<1x2048xf32>
    tpu.vector_store %arg4[%c0_9, %c0_10], %21 {strides = array<i32>} : memref<1x2048xf32, #tpu.memory_space<vmem>>, vector<1x2048xf32>,
    return
  }
  func.func @transform_0(%arg0: i32) -> (i32, i32) {
    %c0_i32 = arith.constant 0 : i32
    %c0_i32_0 = arith.constant 0 : i32
    return %c0_i32, %arg0 : i32, i32
  }
  func.func @transform_1(%arg0: i32) -> i32 {
    %c0_i32 = arith.constant 0 : i32
    %c0_i32_0 = arith.constant 0 : i32
    return %c0_i32 : i32
  }
  func.func @transform_2(%arg0: i32) -> i32 {
    %c0_i32 = arith.constant 0 : i32
    %c0_i32_0 = arith.constant 0 : i32
    return %c0_i32 : i32
  }
  func.func @transform_3(%arg0: i32) -> (i32, i32) {
    %c0_i32 = arith.constant 0 : i32
    %c0_i32_0 = arith.constant 0 : i32
    return %c0_i32, %arg0 : i32, i32
  }
}

</mosaic_0001>

<bundles_post_ra>
// kernel: tpu_custom_call.1
= control target key start
LH: loop header
LB: loop body
LE: loop exit
PB: predicated region body
PF: predicated region fallthrough
CT: control target
= control target key end

     0   :  { %s744_s0 = inlined_call_operand.hbm [shape: f32[4,4096], index: 0, kind: input, shape index: {}]   ;;  %s745_s1 = inlined_call_operand.vmem [shape: f32[4], index: 1, kind: input, shape index: {}]   ;;  %s746_s2 = inlined_call_operand.<no memory space> [shape: f32[1], index: 2, kind: input, shape index: {}]   ;;  %s747_s3 = inlined_call_operand.hbm [shape: f32[1,4096], index: 3, kind: output, shape index: {}]  }
   0x1   :  { %8 = sst [smem:[#allocation2]] %s746_s2 }
   0x2   :  { %9 = vsyncpa [#allocation4], 0 }
   0x3   :  { %11 = vsyncpa [#allocation4 + $0x1], 0 }
   0x4   :  { %12 = vsyncpa [#allocation6], 0 }
   0x5   :  { %13 = vsyncpa [#allocation5], 0 }
   0x6   :  { %15 = vsyncpa [#allocation5 + $0x1], 0  ;;  %s568_s14 = smov 0   ;;  %s570_s15 = smov 0  }
   0x7   :  { %s572_s16 = smov 0   ;;  %s574_s17 = smov 0  }
   0x8 LB: > { %s589_s2 = sadd.s32 4294967295, %s540_s17   ;;  %s344_s18 = sadd.s32 4294967294, %s540_s17   ;;  %s540_s17 = sphi %s574_s17, %s770_s17   ;;  %s536_s16 = sphi %s572_s16, %s769_s16   ;;  %s532_s15 = sphi %s570_s15, %s768_s15   ;;  %s528_s14 = sphi %s568_s14, %s767_s14  }
   0x9   : > { %p41_p0 = scmp.ne.s32.totalorder %s532_s15, %s528_s14  ;;  %p748_p1 = scmp.eq.s32.totalorder %s589_s2, 0 }
   0xa   : > { %p113_p3 = scmp.eq.s32.totalorder %s344_s18, 1  ;;  %p345_p5 = scmp.ge.s32.totalorder %s540_s17, 1 }
   0xb   : > { %p598_p4 = por %p748_p1, %p41_p0  ;;  %p120_p7 = scmp.lt.s32.totalorder %s540_s17, 3 }
   0xc   : > { %p603_p6 = por %p113_p3, %p41_p0  ;;  %s133_s23 = sshll.u32 %s745_s1, 4  ;;  %s134_s23 = int_to_ptr.vmem [resolvable:$true] %s133_s23 }
   0xd   : > { %s752_s19 = scalar_select %p598_p4, 1, 0 }
   0xe   : > { %s753_s20 = scalar_select %p603_p6, 1, 0 }
   0xf   : > { %p611_p8 = pnand %p345_p5, %p120_p7  ;;  %s619_s25 = sadd.s32 1, %s540_s17  }
  0x10   : > { %s25_s27 = ssub.s32 %s540_s17, %s619_s25  ;;  %s28_s29 = sadd.s32 1, %s536_s16 }
  0x11   : > { %s754_s24 = scalar_select %p611_p8, 1, 0 }
  0x12   : > { %p380_p10 = pneg %p611_p8  ;;  %p629_p12 = scmp.eq.s32.totalorder %s25_s27, 0 }
  0x13   : > { %p35_p13 = scmp.ne.s32.totalorder %s536_s16, %s532_s15  ;;  %s429_s30 = scalar_lea.vmem %s134_s23, 16 }
  0x14   : > { %p623_p11 = pnand %p380_p10, %p748_p1  ;;  %p430_p0 = scmp.ne.s32.totalorder %s134_s23, %s429_s30 }
  0x15   : > { %p437_p9 = scmp.lt.s32.totalorder %s134_s23, %s134_s23  ;;  %p438_p2 = scmp.lt.s32.totalorder %s429_s30, %s429_s30 }
  0x16   : > { %p431_p3 = pneg %p623_p11 }
  0x17   : > { %p439_p10 = por %p438_p2, %p437_p9 }
  0x18   : > { %p432_p5 = pnand %p431_p3, %p430_p0 }
  0x1a   : > { %p433_p7 = pneg %p432_p5 }
  0x1c   : > { %p440_p1 = pnand %p439_p10, %p433_p7 }
  0x1e   : > { %443 = shalt.err (!%p440_p1)
}
  0x1f   : > { %s542_s4 = smov [#allocation7]   ;;  %p36_p2 = scmp.eq.s32.totalorder %s540_s17, 0 }
  0x20   : > { %383 = dma.vmem_to_smem (!%p623_p11), %s134_s23, 16, %s542_s4, [#allocation6]  }
  0x21   : > { %s643_s5 = scalar_select %p629_p12, %s536_s16, %s28_s29  }
  0x22   : > { %p757_p1 = scmp.eq.s32.totalorder %s589_s2, 1  ;;  %p393_p0 = scmp.lt.s32.totalorder %s540_s17, 2 }
  0x23   : > { %s147_s7 = sand.u32 1, %s536_s16   ;;  %p37_p3 = por %p36_p2, %p35_p13 }
  0x24   : > { %p651_p9 = por %p757_p1, %p35_p13  ;;  %s348_s8 = sshll.u32 %s147_s7, 6 }
  0x25   : > { %s370_s9 = sshll.u32 %s540_s17, 10  ;;  %s151_s13 = scalar_lea.vmem [#allocation3], %s348_s8 }
  0x26   : > { %s758_s6 = scalar_select %p651_p9, 1, 0 }
  0x27   : > { %s664_s12 = scalar_lea.hbm %s744_s0, %s370_s9  ;;  %s159_s18 = sshll.u32 %s151_s13, 4  ;;  %s160_s18 = int_to_ptr.vmem [resolvable:$true] %s159_s18 }
  0x28   : > { %p666_p11 = pnand %p393_p0, %p37_p3  ;;  %s148_s22 = scalar_lea.sflag [#allocation4], %s147_s7 }
  0x29   : > { %s444_s23 = scalar_lea.hbm %s664_s12, 1024  ;;  %s449_s28 = scalar_lea.hbm %s744_s0, 2048 }
  0x2a   : > { %p445_p12 = scmp.ne.s32.totalorder %s664_s12, %s444_s23  ;;  %p446_p13 = pneg %p666_p11 }
  0x2b   : > { %p450_p10 = scmp.lt.s32.totalorder %s664_s12, %s744_s0  ;;  %p451_p2 = scmp.lt.s32.totalorder %s449_s28, %s444_s23 }
  0x2c   : > { %p447_p5 = pnand %p446_p13, %p445_p12 }
  0x2d   : > { %p452_p1 = por %p451_p2, %p450_p10 }
  0x2e   : > { %p448_p7 = pneg %p447_p5 }
  0x30   : > { %p453_p0 = pnand %p452_p1, %p448_p7 }
  0x32   : > { %456 = shalt.err (!%p453_p0)
}
  0x33   : > { %s457_s4 = scalar_lea.vmem %s160_s18, 1024  ;;  %s543_s7 = smov [#allocation3]  }
  0x34   : > { %p458_p3 = scmp.ne.s32.totalorder %s160_s18, %s457_s4  ;;  %s462_s8 = sshll.u32 %s543_s7, 4  ;;  %s463_s8 = int_to_ptr.vmem [resolvable:$false] %s462_s8 }
  0x35   : > { %s464_s9 = scalar_lea.vmem %s463_s8, 2048  ;;  %p465_p12 = scmp.lt.s32.totalorder %s160_s18, %s463_s8 }
  0x36   : > { %p460_p6 = pnand %p458_p3, %p446_p13  ;;  %p466_p5 = scmp.lt.s32.totalorder %s464_s9, %s457_s4 }
  0x38   : > { %p461_p9 = pneg %p460_p6  ;;  %p467_p4 = por %p466_p5, %p465_p12 }
  0x3a   : > { %p468_p8 = pnand %p467_p4, %p461_p9 }
  0x3c   : > { %471 = shalt.err (!%p468_p8)
}
  0x3d   : > { %387 = dma.hbm_to_vmem [thread:$0]  (!%p666_p11), %s664_s12, 1024, %s160_s18, %s148_s22  }
  0x3e   : > { %p760_p7 = scmp.ne.s32.totalorder %s754_s24, 0 }
  0x3f   : > { %s687_s10 = sand.u32 (!%p760_p7), 1, %s532_s15   ;;  %p761_p6 = scmp.ne.s32.totalorder (!%p760_p7), %s752_s19, 0 }
  0x40   : > { %168 = sbr.rel (%p760_p7) target bundleno = 107 (0x6b), region = 32  ;;  %s352_s11 = sshll.u32 (!%p760_p7), %s687_s10, 6 }
  0x41   : > { %s171_s13 = scalar_lea.sflag (!%p760_p7), [#allocation4], %s687_s10  ;;  %s174_s23 = scalar_lea.vmem (!%p760_p7), [#allocation3], %s352_s11 }
  0x45   : > { %515 = dma.done.wait (%p761_p6), %s171_s13, 1024  }
  0x46   : > { %517 = vsyncadd (%p761_p6), %s171_s13, 4294966272  ;;  %p762_p4 = scmp.eq.s32.totalorder %s589_s2, 0 }
  0x48   : > { %519 = dma.done.wait (%p762_p4), [#allocation6], 16   ;;  %p763_p8 = pmov %p762_p4 }
  0x4a   : > { %521 = vsyncadd (%p763_p8), [#allocation6], 4294967280 }
  0x4b   : > { %183 = sfence }
  0x4c   : > { %s219_s24 = sld [smem:[#allocation7]]  ;;  %v204_v0 = vld [vmem:[%s174_s23] ss:$4 sm:$0xff]  ;;  %v356_v2 = vld [vmem:[%s174_s23 + $0x1] ss:$4 sm:$0xff]  ;;  %s354_s19 = sshll.u32 %s687_s10, 4 }
  0x4d   : > { %s362_s12 = sld [smem:[#allocation7 + $0x1]]  ;;  %v355_v1 = vld [vmem:[%s174_s23 + $0x20] ss:$4 sm:$0xff]  ;;  %v357_v3 = vld [vmem:[%s174_s23 + $0x21] ss:$4 sm:$0xff]  ;;  %s201_s26 = scalar_lea.vmem [#allocation8], %s354_s19 }
  0x4e   : > { %s363_s18 = sld [smem:[#allocation7 + $0x2]]  ;;  %v358_v4 = vld [vmem:[%s174_s23 + $0x2] ss:$4 sm:$0xff]  ;;  %v360_v7 = vld [vmem:[%s174_s23 + $0x3] ss:$4 sm:$0xff]  ;;  %s262_s27 = sshll.u32 %s201_s26, 4  ;;  %s704_s27 = int_to_ptr.vmem [resolvable:$true] %s262_s27 }
  0x4f   : > { %s364_s21 = sld [smem:[#allocation7 + $0x3]]  ;;  %v359_v6 = vld [vmem:[%s174_s23 + $0x22] ss:$4 sm:$0xff]  ;;  %v361_v13 = vld [vmem:[%s174_s23 + $0x23] ss:$4 sm:$0xff]  ;;  %s371_s28 = sshll.u32 %s589_s2, 8 }
  0x50   : > { %s699_s22 = sld [smem:[#allocation2]]  ;;  %s260_s4 = scalar_lea.hbm %s747_s3, %s371_s28 }
  0x51   : > { %s248_s7 = scalar_lea.sflag [#allocation5], %s687_s10  ;;  %s472_s8 = scalar_lea.vmem %s704_s27, 256 }
  0x52   : > { %v220_v5 = vstv %s219_s24  ;;  %p473_p9 = scmp.ne.s32.totalorder %s704_s27, %s472_s8  ;;  %p764_p11 = scmp.ne.s32.totalorder %s758_s6, 0 }
  0x53   : > { %v221_v8 = vmul.f32 %v220_v5, %v204_v0  ;;  %v224_v9 = vstv %s362_s12  ;;  %v222_v10 = vmul.f32 %v355_v1, %v220_v5  ;;  %s544_s2 = smov [#allocation8]  }
  0x54   : > { %v225_v11 = vmul.f32 %v356_v2, %v224_v9  ;;  %v230_v12 = vstv %s363_s18  ;;  %v226_v14 = vmul.f32 %v357_v3, %v224_v9  ;;  %p474_p13 = pnand %p473_p9, %p764_p11  ;;  %s476_s9 = sshll.u32 %s544_s2, 4  ;;  %s477_s9 = int_to_ptr.vmem [resolvable:$false] %s476_s9 }
  0x55   : > { %v231_v15 = vmul.f32 %v358_v4, %v230_v12  ;;  %v236_v16 = vstv %s364_s21  ;;  %v232_v17 = vmul.f32 %v359_v6, %v230_v12  ;;  %s478_s11 = scalar_lea.vmem %s477_s9, 512  ;;  %p479_p2 = scmp.lt.s32.totalorder %s704_s27, %s477_s9 }
  0x56   : > { %v227_v18 = vadd.f32 %v225_v11, %v221_v8  ;;  %v237_v19 = vmul.f32 %v360_v7, %v236_v16  ;;  %v228_v20 = vadd.f32 %v226_v14, %v222_v10  ;;  %v238_v21 = vmul.f32 %v361_v13, %v236_v16  ;;  %p475_p10 = pneg %p474_p13  ;;  %p480_p1 = scmp.lt.s32.totalorder %s478_s11, %s472_s8 }
  0x57   : > { %v242_v24 = vstv %s699_s22 }
  0x58   : > { %v233_v22 = vadd.f32 %v231_v15, %v227_v18  ;;  %v234_v23 = vadd.f32 %v232_v17, %v228_v20  ;;  %p481_p0 = por %p480_p1, %p479_p2 }
  0x5a   : > { %v239_v25 = vadd.f32 %v237_v19, %v233_v22  ;;  %v240_v26 = vadd.f32 %v238_v21, %v234_v23  ;;  %p482_p3 = pnand %p481_p0, %p475_p10 }
  0x5c   : > { %v243_v27 = vadd.f32 %v242_v24, %v239_v25  ;;  %v244_v28 = vadd.f32 %v242_v24, %v240_v26 }
  0x5e   : > { %245 = vst [vmem:[%s201_s26] sm:$0xff] %v243_v27  ;;  %246 = vst [vmem:[%s201_s26 + $0x8] sm:$0xff] %v244_v28 }
  0x5f   : > { %485 = shalt.err (!%p482_p3)
}
  0x60   : > { %s486_s13 = scalar_lea.hbm %s260_s4, 256  ;;  %s490_s24 = scalar_lea.hbm %s747_s3, 512 }
  0x61   : > { %p487_p12 = scmp.ne.s32.totalorder %s260_s4, %s486_s13  ;;  %p491_p6 = scmp.lt.s32.totalorder %s260_s4, %s747_s3 }
  0x62   : > { %p492_p4 = scmp.lt.s32.totalorder %s490_s24, %s486_s13 }
  0x63   : > { %p488_p5 = pnand %p487_p12, %p764_p11 }
  0x64   : > { %p493_p8 = por %p492_p4, %p491_p6 }
  0x65   : > { %p489_p7 = pneg %p488_p5 }
  0x67   : > { %p494_p9 = pnand %p493_p8, %p489_p7 }
  0x69   : > { %497 = shalt.err (!%p494_p9)
}
  0x6a   : > { %378 = dma.vmem_to_hbm [thread:$0]  (%p764_p11), %s704_s27, 256, %s260_s4, %s248_s7  }
  0x6b PF: > { %s274_s21 = sand.u32 1, %s528_s14   ;;  %p765_p13 = scmp.ne.s32.totalorder %s753_s20, 0 }
  0x6c   : > { %p766_p10 = scmp.ge.s32.totalorder %s540_s17, 2  ;;  %s275_s22 = scalar_lea.sflag [#allocation5], %s274_s21 }
  0x6e   : > { %p389_p2 = pnand %p766_p10, %p765_p13 }
  0x70   : > { %p390_p1 = pneg %p389_p2 }
  0x72   : > { %523 = dma.done.wait (%p390_p1), %s275_s22, 256  }
  0x73   : > { %525 = vsyncadd (%p390_p1), %s275_s22, 4294967040  ;;  %p18_p0 = scmp.ge.s32.totalorder %s619_s25, 4   ;;  %s767_s14 = smov %s532_s15 }
  0x74   : > { %s768_s15 = smov %s536_s16  ;;  %s769_s16 = smov %s643_s5 }
  0x75   : > { %s770_s17 = smov %s619_s25  ;;  %20 = sbr.rel (!%p18_p0) target bundleno = 8 (0x8), region = 89 }
  0x7a   :  { %280 = vsyncpa [#allocation4], 1 }
  0x7b   :  { %282 = vsyncpa [#allocation4 + $0x1], 1 }
  0x7c   :  { %283 = vsyncpa [#allocation5], 1 }
  0x7d   :  { %285 = vsyncpa [#allocation5 + $0x1], 1 }
  0x7e   :  { %286 = vsyncpa [#allocation6], 1 }
  0x7f   :  { %288 = vsyncpa [#allocation6 + $0x1], 1 }

</bundles_post_ra>
